<compile_context>
chip_gen: v6e
topology: v6e:2x2x1
jax: 0.10.0
libtpu: 0.0.40
codegen_flags: <defaults>
</compile_context>

<pallas_src>
import functools

import jax
import jax.numpy as jnp
from jax import lax
from jax.experimental import pallas as pl
from jax.experimental.pallas import tpu as pltpu


def _mpnn_kernel(h_ref, adj_ref, e_ref,
                 wm1_ref, wm3_ref, whu_ref, wu2_ref, bm_ref, bu_ref,
                 out_ref,
                 acc_ah, acc_ew,
                 *, tile_i):
    """Grid = (batch, sender_tiles). Accumulates over sender tiles in VMEM."""
    it = pl.program_id(1)
    n_it = pl.num_programs(1)
    D = out_ref.shape[-1]

    @pl.when(it == 0)
    def _init():
        acc_ah[...] = jnp.zeros_like(acc_ah)   # (N, D+1): [adj^T @ h | deg]
        acc_ew[...] = jnp.zeros_like(acc_ew)   # (N, D):   sum_i adj[i,j]*e[i,j,:]

    adj_t = adj_ref[0].astype(jnp.float32)     # (TI, N)
    e_t = e_ref[0].astype(jnp.float32)         # (TI, N, D)

    # Sender rows of the (resident) augmented h block for this tile.
    start = pl.multiple_of(it * tile_i, tile_i)
    h_t = h_ref[0, pl.ds(start, tile_i), :].astype(jnp.float32)  # (TI, D+1)

    # acc_ah[j, :] += sum_i adj[i, j] * [h_i | 1]   (MXU, transposed-lhs matmul;
    # the last column accumulates the receiver degree deg[j] for free)
    acc_ah[...] += lax.dot_general(
        adj_t, h_t, (((0,), (0,)), ((), ())),
        preferred_element_type=jnp.float32)

    # acc_ew[j, :] += sum_i adj[i, j] * e[i, j, :]  (VPU multiply + cross-vreg add)
    acc_ew[...] += jnp.sum(adj_t[:, :, None] * e_t, axis=0)

    @pl.when(it == n_it - 1)
    def _finalize():
        h_nodes = h_ref[0, :, :D].astype(jnp.float32)              # (N, D)
        # Fused per-node projection through [W2 | Wu1] -> (N, 2D)
        hp = jnp.dot(h_nodes, whu_ref[...],
                     preferred_element_type=jnp.float32)
        deg = acc_ah[:, D:]                                        # (N, 1)
        msum = (jnp.dot(acc_ah[:, :D], wm1_ref[...],
                        preferred_element_type=jnp.float32)
                + jnp.dot(acc_ew[...], wm3_ref[...],
                          preferred_element_type=jnp.float32)
                + deg * (hp[:, :D] + bm_ref[...]))
        out = (hp[:, D:]
               + jnp.dot(msum, wu2_ref[...],
                         preferred_element_type=jnp.float32)
               + bu_ref[...])
        out_ref[0] = out.astype(out_ref.dtype)


def mpnn_layer(h, adj, e, params, *, tile_i=None):
    B, N, D = h.shape
    wm, bm = params["wm"], params["bm"]     # (D, 3D), (D,)
    wu, bu = params["wu"], params["bu"]     # (D, 2D), (D,)

    f32 = jnp.float32
    # Split & pre-transpose weights so the kernel does plain row-major x @ W.
    wm1 = jnp.transpose(wm[:, :D]).astype(f32)        # acts on h_i (via adj^T h)
    wm2 = jnp.transpose(wm[:, D:2 * D]).astype(f32)   # acts on h_j
    wm3 = jnp.transpose(wm[:, 2 * D:]).astype(f32)    # acts on e_ij
    wu1 = jnp.transpose(wu[:, :D]).astype(f32)        # acts on h_j (node update)
    wu2 = jnp.transpose(wu[:, D:]).astype(f32)        # acts on aggregated message
    whu = jnp.concatenate([wm2, wu1], axis=1)         # fused (D, 2D) per-node proj
    bm2 = bm.reshape(1, D).astype(f32)
    bu2 = bu.reshape(1, D).astype(f32)

    # Augment h with a ones column: adj^T @ [h | 1] yields adj^T h AND deg.
    h_aug = jnp.concatenate([h, jnp.ones((B, N, 1), h.dtype)], axis=-1)

    # Sender-tile size: multiple of 8 dividing N, e-tile <= ~4 MiB so that the
    # double-buffered pipeline fits the default scoped-VMEM limit everywhere.
    if tile_i is None:
        budget = 4 * 1024 * 1024
        per_row = N * D * e.dtype.itemsize
        ti = min(N, max(8, budget // max(per_row, 1)))
        ti = (ti // 8) * 8
        while ti >= 8 and N % ti != 0:
            ti -= 8
        tile_i = ti if ti >= 8 else N
    if N % tile_i != 0:
        tile_i = N
    n_it = N // tile_i

    kernel = functools.partial(_mpnn_kernel, tile_i=tile_i)

    itemsize = e.dtype.itemsize
    cost = pl.CostEstimate(
        flops=int(B * (2 * N * N * (D + 1)        # adj^T @ [h|1]
                       + 2 * N * N * D            # adj-weighted e contraction
                       + 2 * N * D * (2 * D)      # h @ [W2|Wu1]
                       + 3 * 2 * N * D * D)),     # three DxD matmuls
        transcendentals=0,
        bytes_accessed=int(e.size * itemsize + adj.size * adj.dtype.itemsize
                           + h_aug.size * h_aug.dtype.itemsize
                           + B * N * D * h.dtype.itemsize
                           + (wm.size + wu.size + bm.size + bu.size) * 4),
    )

    return pl.pallas_call(
        kernel,
        out_shape=jax.ShapeDtypeStruct((B, N, D), h.dtype),
        grid_spec=pltpu.PrefetchScalarGridSpec(
            num_scalar_prefetch=0,
            grid=(B, n_it),
            in_specs=[
                pl.BlockSpec((1, N, D + 1), lambda b, i: (b, 0, 0)),        # h_aug (resident)
                pl.BlockSpec((1, tile_i, N), lambda b, i: (b, i, 0)),       # adj sender tile
                pl.BlockSpec((1, tile_i, N, D), lambda b, i: (b, i, 0, 0)),  # e sender tile
                pl.BlockSpec((D, D), lambda b, i: (0, 0)),                  # wm1
                pl.BlockSpec((D, D), lambda b, i: (0, 0)),                  # wm3
                pl.BlockSpec((D, 2 * D), lambda b, i: (0, 0)),              # [wm2 | wu1]
                pl.BlockSpec((D, D), lambda b, i: (0, 0)),                  # wu2
                pl.BlockSpec((1, D), lambda b, i: (0, 0)),                  # bm
                pl.BlockSpec((1, D), lambda b, i: (0, 0)),                  # bu
            ],
            out_specs=pl.BlockSpec((1, N, D), lambda b, i: (b, 0, 0)),
            scratch_shapes=[
                pltpu.VMEM((N, D + 1), jnp.float32),   # acc_ah = [adj^T h | deg]
                pltpu.VMEM((N, D), jnp.float32),       # acc_ew = adj-weighted e sum
            ],
        ),
        compiler_params=pltpu.CompilerParams(
            dimension_semantics=("parallel", "arbitrary")),
        cost_estimate=cost,
    )(h_aug, adj, e, wm1, wm3, whu, wu2, bm2, bu2)


def mpnn_ref(h, adj, e, params):
    """Pure-JAX reference matching the PyTorch forward exactly."""
    B, N, D = h.shape
    h1 = jnp.broadcast_to(h[:, :, None, :], (B, N, N, D))
    h2 = jnp.broadcast_to(h[:, None, :, :], (B, N, N, D))
    m = jnp.concatenate([h1, h2, e], axis=3)
    m = m @ params["wm"].T + params["bm"]
    m = m * adj[:, :, :, None]
    m = m.sum(axis=1)
    h_cat = jnp.concatenate([h, m], axis=2)
    return h_cat @ params["wu"].T + params["bu"]


def init_params(key, hid_dim):
    """Deterministic PyTorch-Linear-style init: U(-1/sqrt(fan_in), 1/sqrt(fan_in))."""
    k1, k2, k3, k4 = jax.random.split(key, 4)
    fan_m = 3 * hid_dim
    fan_u = 2 * hid_dim
    lim_m = 1.0 / jnp.sqrt(fan_m)
    lim_u = 1.0 / jnp.sqrt(fan_u)
    return {
        "wm": jax.random.uniform(k1, (hid_dim, fan_m), jnp.float32, -lim_m, lim_m),
        "bm": jax.random.uniform(k2, (hid_dim,), jnp.float32, -lim_m, lim_m),
        "wu": jax.random.uniform(k3, (hid_dim, fan_u), jnp.float32, -lim_u, lim_u),
        "bu": jax.random.uniform(k4, (hid_dim,), jnp.float32, -lim_u, lim_u),
    }


if __name__ == "__main__":
    B, N, D = 2, 16, 32
    key = jax.random.PRNGKey(0)
    kh, ka, ke, kp = jax.random.split(key, 4)

    h = jax.random.normal(kh, (B, N, D), jnp.float32)
    adj = jax.random.bernoulli(ka, 0.5, (B, N, N)).astype(jnp.float32)
    e = jax.random.normal(ke, (B, N, N, D), jnp.float32)
    params = init_params(kp, D)

    # tile_i=8 -> two sender tiles per batch, exercising the accumulation path.
    out = mpnn_layer(h, adj, e, params, tile_i=8)
    out = jax.block_until_ready(out)

    ref = mpnn_ref(h, adj, e, params)
    assert out.shape == (B, N, D)
    assert jnp.allclose(out, ref, rtol=1e-4, atol=1e-4), "mismatch vs reference"
    print("KERNEL_OK")
</pallas_src>

<mosaic_0001>
module attributes {stable_mosaic.version = 11 : i64} {
  func.func @_mpnn_kernel(%arg0: i32, %arg1: i32, %arg2: memref<1x16x33xf32, #tpu.memory_space<vmem>>, %arg3: memref<1x8x16xf32, #tpu.memory_space<vmem>>, %arg4: memref<1x8x16x32xf32, #tpu.memory_space<vmem>>, %arg5: memref<32x32xf32, #tpu.memory_space<vmem>>, %arg6: memref<32x32xf32, #tpu.memory_space<vmem>>, %arg7: memref<32x64xf32, #tpu.memory_space<vmem>>, %arg8: memref<32x32xf32, #tpu.memory_space<vmem>>, %arg9: memref<1x32xf32, #tpu.memory_space<vmem>>, %arg10: memref<1x32xf32, #tpu.memory_space<vmem>>, %arg11: memref<1x16x32xf32, #tpu.memory_space<vmem>>, %arg12: memref<16x33xf32, #tpu.memory_space<vmem>>, %arg13: memref<16x32xf32, #tpu.memory_space<vmem>>) attributes {dimension_semantics = [#tpu.dimension_semantics<parallel>, #tpu.dimension_semantics<arbitrary>], iteration_bounds = array<i64: 2, 2>, scalar_prefetch = 0 : i64, scratch_operands = 2 : i64, tpu.core_type = #tpu.core_type<tc>, window_params = [{transform_indices = @transform_0, window_bounds = array<i64: 1, 16, 33>}, {transform_indices = @transform_1, window_bounds = array<i64: 1, 8, 16>}, {transform_indices = @transform_2, window_bounds = array<i64: 1, 8, 16, 32>}, {pipeline_mode = #tpu.pipeline_mode<synchronous>, transform_indices = @transform_3, window_bounds = array<i64: 32, 32>}, {pipeline_mode = #tpu.pipeline_mode<synchronous>, transform_indices = @transform_4, window_bounds = array<i64: 32, 32>}, {pipeline_mode = #tpu.pipeline_mode<synchronous>, transform_indices = @transform_5, window_bounds = array<i64: 32, 64>}, {pipeline_mode = #tpu.pipeline_mode<synchronous>, transform_indices = @transform_6, window_bounds = array<i64: 32, 32>}, {pipeline_mode = #tpu.pipeline_mode<synchronous>, transform_indices = @transform_7, window_bounds = array<i64: 1, 32>}, {pipeline_mode = #tpu.pipeline_mode<synchronous>, transform_indices = @transform_8, window_bounds = array<i64: 1, 32>}, {transform_indices = @transform_9, window_bounds = array<i64: 1, 16, 32>}]} {
    %c0_i32 = arith.constant 0 : i32
    %0 = arith.cmpi eq, %arg1, %c0_i32 : i32
    %1 = arith.extui %0 : i1 to i32
    %c0_i32_0 = arith.constant 0 : i32
    %2 = arith.cmpi ne, %1, %c0_i32_0 : i32
    scf.if %2 {
      %cst_19 = arith.constant 0.000000e+00 : f32
      %26 = vector.broadcast %cst_19 : f32 to vector<16x33xf32>
      %c0_20 = arith.constant 0 : index
      %c0_21 = arith.constant 0 : index
      %27 = vector.load %arg12[%c0_20, %c0_21] : memref<16x33xf32, #tpu.memory_space<vmem>>, vector<16x33xf32>
      tpu.vector_store %arg12[%c0_20, %c0_21], %26 {strides = array<i32>} : memref<16x33xf32, #tpu.memory_space<vmem>>, vector<16x33xf32>,
      %cst_22 = arith.constant 0.000000e+00 : f32
      %28 = vector.broadcast %cst_22 : f32 to vector<16x32xf32>
      %c0_23 = arith.constant 0 : index
      %c0_24 = arith.constant 0 : index
      %29 = vector.load %arg13[%c0_23, %c0_24] : memref<16x32xf32, #tpu.memory_space<vmem>>, vector<16x32xf32>
      tpu.vector_store %arg13[%c0_23, %c0_24], %28 {strides = array<i32>} : memref<16x32xf32, #tpu.memory_space<vmem>>, vector<16x32xf32>,
    } else {
    }
    %c0 = arith.constant 0 : index
    %c0_1 = arith.constant 0 : index
    %c0_2 = arith.constant 0 : index
    %3 = vector.load %arg3[%c0, %c0_1, %c0_2] : memref<1x8x16xf32, #tpu.memory_space<vmem>>, vector<1x8x16xf32>
    %4 = vector.shape_cast %3 : vector<1x8x16xf32> to vector<8x16xf32>
    %c0_3 = arith.constant 0 : index
    %c0_4 = arith.constant 0 : index
    %c0_5 = arith.constant 0 : index
    %c0_6 = arith.constant 0 : index
    %5 = vector.load %arg4[%c0_3, %c0_4, %c0_5, %c0_6] : memref<1x8x16x32xf32, #tpu.memory_space<vmem>>, vector<1x8x16x32xf32>
    %6 = vector.shape_cast %5 : vector<1x8x16x32xf32> to vector<8x16x32xf32>
    %c8_i32 = arith.constant 8 : i32
    %7 = arith.muli %arg1, %c8_i32 : i32
    %8 = tpu.assume_multiple %7, 8 : i32
    %c0_7 = arith.constant 0 : index
    %9 = arith.index_cast %8 : i32 to index
    %c0_8 = arith.constant 0 : index
    %10 = vector.load %arg2[%c0_7, %9, %c0_8] : memref<1x16x33xf32, #tpu.memory_space<vmem>>, vector<1x8x33xf32>
    %11 = vector.shape_cast %10 : vector<1x8x33xf32> to vector<8x33xf32>
    %c0_9 = arith.constant 0 : index
    %c0_10 = arith.constant 0 : index
    %12 = vector.load %arg12[%c0_9, %c0_10] : memref<16x33xf32, #tpu.memory_space<vmem>>, vector<16x33xf32>
    %cst = arith.constant dense<0.000000e+00> : vector<16x33xf32>
    %13 = tpu.matmul %4, %11, %cst {dimension_numbers = #tpu.dot_dimension_numbers<[0], [0], [1], [1], [0, 1, 1, 1], [], []>} : vector<8x16xf32>, vector<8x33xf32>, vector<16x33xf32> -> vector<16x33xf32>
    %14 = arith.addf %12, %13 : vector<16x33xf32>
    %c0_11 = arith.constant 0 : index
    %c0_12 = arith.constant 0 : index
    %15 = vector.load %arg12[%c0_11, %c0_12] : memref<16x33xf32, #tpu.memory_space<vmem>>, vector<16x33xf32>
    tpu.vector_store %arg12[%c0_11, %c0_12], %14 {strides = array<i32>} : memref<16x33xf32, #tpu.memory_space<vmem>>, vector<16x33xf32>,
    %c0_13 = arith.constant 0 : index
    %c0_14 = arith.constant 0 : index
    %16 = vector.load %arg13[%c0_13, %c0_14] : memref<16x32xf32, #tpu.memory_space<vmem>>, vector<16x32xf32>
    %17 = vector.shape_cast %4 : vector<8x16xf32> to vector<8x16x1xf32>
    %18 = vector.broadcast %17 : vector<8x16x1xf32> to vector<8x16x32xf32>
    %19 = arith.mulf %18, %6 : vector<8x16x32xf32>
    %cst_15 = arith.constant dense<0.000000e+00> : vector<16x32xf32>
    %20 = vector.multi_reduction <add>, %19, %cst_15 [0] : vector<8x16x32xf32> to vector<16x32xf32>
    %21 = arith.addf %16, %20 : vector<16x32xf32>
    %c0_16 = arith.constant 0 : index
    %c0_17 = arith.constant 0 : index
    %22 = vector.load %arg13[%c0_16, %c0_17] : memref<16x32xf32, #tpu.memory_space<vmem>>, vector<16x32xf32>
    tpu.vector_store %arg13[%c0_16, %c0_17], %21 {strides = array<i32>} : memref<16x32xf32, #tpu.memory_space<vmem>>, vector<16x32xf32>,
    %c1_i32 = arith.constant 1 : i32
    %23 = arith.cmpi eq, %arg1, %c1_i32 : i32
    %24 = arith.extui %23 : i1 to i32
    %c0_i32_18 = arith.constant 0 : i32
    %25 = arith.cmpi ne, %24, %c0_i32_18 : i32
    scf.if %25 {
      %c0_19 = arith.constant 0 : index
      %c0_20 = arith.constant 0 : index
      %c0_21 = arith.constant 0 : index
      %26 = vector.load %arg2[%c0_19, %c0_20, %c0_21] : memref<1x16x33xf32, #tpu.memory_space<vmem>>, vector<1x16x32xf32>
      %27 = vector.shape_cast %26 : vector<1x16x32xf32> to vector<16x32xf32>
      %c0_22 = arith.constant 0 : index
      %c0_23 = arith.constant 0 : index
      %28 = vector.load %arg7[%c0_22, %c0_23] : memref<32x64xf32, #tpu.memory_space<vmem>>, vector<32x64xf32>
      %cst_24 = arith.constant dense<0.000000e+00> : vector<16x64xf32>
      %29 = tpu.matmul %27, %28, %cst_24 {dimension_numbers = #tpu.dot_dimension_numbers<[1], [0], [0], [1], [0, 0, 1, 1], [], []>} : vector<16x32xf32>, vector<32x64xf32>, vector<16x64xf32> -> vector<16x64xf32>
      %c0_25 = arith.constant 0 : index
      %c32 = arith.constant 32 : index
      %30 = vector.load %arg12[%c0_25, %c32] : memref<16x33xf32, #tpu.memory_space<vmem>>, vector<16x1xf32>
      %c0_26 = arith.constant 0 : index
      %c0_27 = arith.constant 0 : index
      %31 = vector.load %arg12[%c0_26, %c0_27] : memref<16x33xf32, #tpu.memory_space<vmem>>, vector<16x32xf32>
      %c0_28 = arith.constant 0 : index
      %c0_29 = arith.constant 0 : index
      %32 = vector.load %arg5[%c0_28, %c0_29] : memref<32x32xf32, #tpu.memory_space<vmem>>, vector<32x32xf32>
      %cst_30 = arith.constant dense<0.000000e+00> : vector<16x32xf32>
      %33 = tpu.matmul %31, %32, %cst_30 {dimension_numbers = #tpu.dot_dimension_numbers<[1], [0], [0], [1], [0, 0, 1, 1], [], []>} : vector<16x32xf32>, vector<32x32xf32>, vector<16x32xf32> -> vector<16x32xf32>
      %c0_31 = arith.constant 0 : index
      %c0_32 = arith.constant 0 : index
      %34 = vector.load %arg13[%c0_31, %c0_32] : memref<16x32xf32, #tpu.memory_space<vmem>>, vector<16x32xf32>
      %c0_33 = arith.constant 0 : index
      %c0_34 = arith.constant 0 : index
      %35 = vector.load %arg6[%c0_33, %c0_34] : memref<32x32xf32, #tpu.memory_space<vmem>>, vector<32x32xf32>
      %cst_35 = arith.constant dense<0.000000e+00> : vector<16x32xf32>
      %36 = tpu.matmul %34, %35, %cst_35 {dimension_numbers = #tpu.dot_dimension_numbers<[1], [0], [0], [1], [0, 0, 1, 1], [], []>} : vector<16x32xf32>, vector<32x32xf32>, vector<16x32xf32> -> vector<16x32xf32>
      %37 = arith.addf %33, %36 : vector<16x32xf32>
      %38 = vector.extract_strided_slice %29 {offsets = [0, 0], sizes = [16, 32], strides = [1, 1]} : vector<16x64xf32> to vector<16x32xf32>
      %c0_36 = arith.constant 0 : index
      %c0_37 = arith.constant 0 : index
      %39 = vector.load %arg9[%c0_36, %c0_37] : memref<1x32xf32, #tpu.memory_space<vmem>>, vector<1x32xf32>
      %40 = vector.broadcast %39 : vector<1x32xf32> to vector<16x32xf32>
      %41 = arith.addf %38, %40 : vector<16x32xf32>
      %42 = vector.broadcast %30 : vector<16x1xf32> to vector<16x32xf32>
      %43 = arith.mulf %42, %41 : vector<16x32xf32>
      %44 = arith.addf %37, %43 : vector<16x32xf32>
      %45 = vector.extract_strided_slice %29 {offsets = [0, 32], sizes = [16, 32], strides = [1, 1]} : vector<16x64xf32> to vector<16x32xf32>
      %c0_38 = arith.constant 0 : index
      %c0_39 = arith.constant 0 : index
      %46 = vector.load %arg8[%c0_38, %c0_39] : memref<32x32xf32, #tpu.memory_space<vmem>>, vector<32x32xf32>
      %cst_40 = arith.constant dense<0.000000e+00> : vector<16x32xf32>
      %47 = tpu.matmul %44, %46, %cst_40 {dimension_numbers = #tpu.dot_dimension_numbers<[1], [0], [0], [1], [0, 0, 1, 1], [], []>} : vector<16x32xf32>, vector<32x32xf32>, vector<16x32xf32> -> vector<16x32xf32>
      %48 = arith.addf %45, %47 : vector<16x32xf32>
      %c0_41 = arith.constant 0 : index
      %c0_42 = arith.constant 0 : index
      %49 = vector.load %arg10[%c0_41, %c0_42] : memref<1x32xf32, #tpu.memory_space<vmem>>, vector<1x32xf32>
      %50 = vector.broadcast %49 : vector<1x32xf32> to vector<16x32xf32>
      %51 = arith.addf %48, %50 : vector<16x32xf32>
      %c0_43 = arith.constant 0 : index
      %c0_44 = arith.constant 0 : index
      %c0_45 = arith.constant 0 : index
      %52 = vector.load %arg11[%c0_43, %c0_44, %c0_45] : memref<1x16x32xf32, #tpu.memory_space<vmem>>, vector<1x16x32xf32>
      %53 = vector.shape_cast %52 : vector<1x16x32xf32> to vector<16x32xf32>
      %54 = vector.shape_cast %51 : vector<16x32xf32> to vector<1x16x32xf32>
      tpu.vector_store %arg11[%c0_43, %c0_44, %c0_45], %54 {strides = array<i32>} : memref<1x16x32xf32, #tpu.memory_space<vmem>>, vector<1x16x32xf32>,
    } else {
    }
    return
  }
  func.func @transform_0(%arg0: i32, %arg1: i32) -> (i32, i32, i32) {
    %c0_i32 = arith.constant 0 : i32
    %c0_i32_0 = arith.constant 0 : i32
    %c0_i32_1 = arith.constant 0 : i32
    return %arg0, %c0_i32, %c0_i32_0 : i32, i32, i32
  }
  func.func @transform_1(%arg0: i32, %arg1: i32) -> (i32, i32, i32) {
    %c0_i32 = arith.constant 0 : i32
    %c0_i32_0 = arith.constant 0 : i32
    return %arg0, %arg1, %c0_i32 : i32, i32, i32
  }
  func.func @transform_2(%arg0: i32, %arg1: i32) -> (i32, i32, i32, i32) {
    %c0_i32 = arith.constant 0 : i32
    %c0_i32_0 = arith.constant 0 : i32
    %c0_i32_1 = arith.constant 0 : i32
    return %arg0, %arg1, %c0_i32, %c0_i32_0 : i32, i32, i32, i32
  }
  func.func @transform_3(%arg0: i32, %arg1: i32) -> (i32, i32) {
    %c0_i32 = arith.constant 0 : i32
    %c0_i32_0 = arith.constant 0 : i32
    %c0_i32_1 = arith.constant 0 : i32
    return %c0_i32, %c0_i32_0 : i32, i32
  }
  func.func @transform_4(%arg0: i32, %arg1: i32) -> (i32, i32) {
    %c0_i32 = arith.constant 0 : i32
    %c0_i32_0 = arith.constant 0 : i32
    %c0_i32_1 = arith.constant 0 : i32
    return %c0_i32, %c0_i32_0 : i32, i32
  }
  func.func @transform_5(%arg0: i32, %arg1: i32) -> (i32, i32) {
    %c0_i32 = arith.constant 0 : i32
    %c0_i32_0 = arith.constant 0 : i32
    %c0_i32_1 = arith.constant 0 : i32
    return %c0_i32, %c0_i32_0 : i32, i32
  }
  func.func @transform_6(%arg0: i32, %arg1: i32) -> (i32, i32) {
    %c0_i32 = arith.constant 0 : i32
    %c0_i32_0 = arith.constant 0 : i32
    %c0_i32_1 = arith.constant 0 : i32
    return %c0_i32, %c0_i32_0 : i32, i32
  }
  func.func @transform_7(%arg0: i32, %arg1: i32) -> (i32, i32) {
    %c0_i32 = arith.constant 0 : i32
    %c0_i32_0 = arith.constant 0 : i32
    %c0_i32_1 = arith.constant 0 : i32
    return %c0_i32, %c0_i32_0 : i32, i32
  }
  func.func @transform_8(%arg0: i32, %arg1: i32) -> (i32, i32) {
    %c0_i32 = arith.constant 0 : i32
    %c0_i32_0 = arith.constant 0 : i32
    %c0_i32_1 = arith.constant 0 : i32
    return %c0_i32, %c0_i32_0 : i32, i32
  }
  func.func @transform_9(%arg0: i32, %arg1: i32) -> (i32, i32, i32) {
    %c0_i32 = arith.constant 0 : i32
    %c0_i32_0 = arith.constant 0 : i32
    %c0_i32_1 = arith.constant 0 : i32
    return %arg0, %c0_i32, %c0_i32_0 : i32, i32, i32
  }
}

</mosaic_0001>

<bundles_post_ra>
// kernel: tpu_custom_call.1
= control target key start
LH: loop header
LB: loop body
LE: loop exit
PB: predicated region body
PF: predicated region fallthrough
CT: control target
= control target key end

     0   :  { %s2482_s0 = inlined_call_operand.hbm [shape: f32[2,16,33], index: 0, kind: input, shape index: {}]   ;;  %s2483_s1 = inlined_call_operand.hbm [shape: f32[2,16,16], index: 1, kind: input, shape index: {}]   ;;  %s2484_s2 = inlined_call_operand.hbm [shape: f32[2,16,16,32], index: 2, kind: input, shape index: {}]   ;;  %s2485_s3 = inlined_call_operand.hbm [shape: f32[32,32], index: 3, kind: input, shape index: {}]   ;;  %s2486_s4 = inlined_call_operand.hbm [shape: f32[32,32], index: 4, kind: input, shape index: {}]   ;;  %s2487_s5 = inlined_call_operand.hbm [shape: f32[32,64], index: 5, kind: input, shape index: {}]   ;;  %s2488_s6 = inlined_call_operand.hbm [shape: f32[32,32], index: 6, kind: input, shape index: {}]   ;;  %s2489_s7 = inlined_call_operand.vmem [shape: f32[1,32], index: 7, kind: input, shape index: {}]   ;;  %s2490_s8 = inlined_call_operand.vmem [shape: f32[1,32], index: 8, kind: input, shape index: {}]   ;;  %s2491_s9 = inlined_call_operand.hbm [shape: f32[2,16,32], index: 9, kind: output, shape index: {}]  }
   0x1   :  { %2516 = sst [smem:[#allocation35_spill]] %s2483_s1 }
   0x2   :  { %2517 = sst [smem:[#allocation36_spill]] %s2485_s3 }
   0x3   :  { %2518 = sst [smem:[#allocation37_spill]] %s2486_s4 }
   0x4   :  { %2519 = sst [smem:[#allocation38_spill]] %s2487_s5 }
   0x5   :  { %2520 = sst [smem:[#allocation39_spill]] %s2488_s6 }
   0x6   :  { %2521 = sst [smem:[#allocation40_spill]] %s2489_s7 }
   0x7   :  { %2522 = sst [smem:[#allocation41_spill]] %s2490_s8 }
   0x8   :  { %2523 = sst [smem:[#allocation42_spill]] %s2491_s9 }
   0x9   :  { %14 = vsyncpa [#allocation5], 0 }
   0xa   :  { %16 = vsyncpa [#allocation5 + $0x1], 0 }
   0xb   :  { %17 = vsyncpa [#allocation8], 0 }
   0xc   :  { %19 = vsyncpa [#allocation8 + $0x1], 0 }
   0xd   :  { %20 = vsyncpa [#allocation11], 0 }
   0xe   :  { %21 = vsyncpa [#allocation14], 0 }
   0xf   :  { %22 = vsyncpa [#allocation6], 0 }
  0x10   :  { %24 = vsyncpa [#allocation6 + $0x1], 0  ;;  %s2063_s30 = smov 0   ;;  %s2065_s10 = smov 0  }
  0x11   :  { %s2067_s11 = smov 0   ;;  %s2069_s12 = smov 0  }
  0x12   :  { %s2071_s13 = smov 0   ;;  %s2073_s14 = smov 0  }
  0x13   :  { %s2075_s15 = smov 0   ;;  %s2077_s16 = smov 0  }
  0x14   :  { %s2079_s17 = smov 0   ;;  %s2081_s18 = smov 0  }
  0x15   :  { %s2083_s19 = smov 0  }
  0x16 LB: > { %2524 = sst [smem:[#allocation22_spill]] %s1959_s10  ;;  %s2119_s20 = sadd.s32 4294967295, %s1995_s19   ;;  %s1995_s19 = sphi %s2083_s19, %s30_s19   ;;  %s1991_s18 = sphi %s2081_s18, %s2589_s18   ;;  %s1987_s17 = sphi %s2079_s17, %s2588_s17   ;;  %s1983_s16 = sphi %s2077_s16, %s2587_s16   ;;  %s1979_s15 = sphi %s2075_s15, %s2586_s15   ;;  %s1975_s14 = sphi %s2073_s14, %s2581_s14   ;;  %s1971_s13 = sphi %s2071_s13, %s2585_s13   ;;  %s1967_s12 = sphi %s2069_s12, %s2584_s12   ;;  %s1963_s11 = sphi %s2067_s11, %s2579_s11   ;;  %s1959_s10 = sphi %s2065_s10, %s2578_s10   ;;  %s1955_s30 = sphi %s2063_s30, %s2577_s30  }
  0x17   : > { %2525 = sst [smem:[#allocation23_spill]] %s1963_s11  ;;  %p1387_p0 = scmp.ge.s32.totalorder %s1995_s19, 1 }
  0x18   : > { %2526 = sst [smem:[#allocation24_spill]] %s1967_s12  ;;  %p2513_p1 = scmp.eq.s32.totalorder %s2119_s20, 0 }
  0x19   : > { %2527 = sst [smem:[#allocation25_spill]] %s1975_s14  ;;  %p281_p2 = scmp.lt.s32.totalorder %s1995_s19, 5 }
  0x1a   : > { %2528 = sst [smem:[#allocation26_spill]] %s1979_s15  ;;  %s1997_s22 = smov [#allocation10]  }
  0x1b   : > { %2529 = sst [smem:[#allocation27_spill]] %s1983_s16  ;;  %p2124_p3 = pnand %p1387_p0, %p281_p2 }
  0x1c   : > { %s293_s23 = sshll.u32 %s1997_s22, 4  ;;  %s1998_s25 = smov [#allocation13]   ;;  %s294_s23 = int_to_ptr.vmem [resolvable:$true] %s293_s23 }
  0x1d   : > { %s2530_s21 = scalar_select %p2124_p3, 1, 0 }
  0x1e   : > { %p1536_p4 = pneg %p2124_p3  ;;  %s319_s26 = sshll.u32 %s1998_s25, 4  ;;  %s320_s26 = int_to_ptr.vmem [resolvable:$true] %s319_s26 }
  0x1f   : > { %s1686_s27 = scalar_lea.vmem %s294_s23, 512  ;;  %p1694_p10 = scmp.lt.s32.totalorder %s294_s23, %s294_s23 }
  0x20   : > { %p2132_p5 = pnand %p1536_p4, %p2513_p1  ;;  %p1687_p7 = scmp.ne.s32.totalorder %s294_s23, %s1686_s27 }
  0x21   : > { %p1695_p11 = scmp.lt.s32.totalorder %s1686_s27, %s1686_s27 }
  0x22   : > { %p2497_p6 = pneg %p2132_p5 }
  0x23   : > { %p1696_p12 = por %p1695_p11, %p1694_p10 }
  0x24   : > { %p1689_p8 = pnand %p1687_p7, %p2497_p6 }
  0x26   : > { %p1690_p9 = pneg %p1689_p8 }
  0x28   : > { %p1697_p13 = pnand %p1696_p12, %p1690_p9 }
  0x2a   : > { %1700 = shalt.err (!%p1697_p13)
}
  0x2b   : > { %s2493_s28 = smov 128   ;;  %s2495_s29 = smov 8  }
  0x2c   : > { %s2532_s3 = sld [smem:[#allocation36_spill]]  ;;  %s1712_s9 = scalar_lea.vmem %s320_s26, 512 }
  0x2d   : > { %p1713_p0 = scmp.ne.s32.totalorder %s320_s26, %s1712_s9  ;;  %p1720_p7 = scmp.lt.s32.totalorder %s320_s26, %s320_s26 }
  0x2e   : > { %p1721_p8 = scmp.lt.s32.totalorder %s1712_s9, %s1712_s9 }
  0x2f   : > { %p1715_p2 = pnand %p1713_p0, %p2497_p6 }
  0x30   : > { %p1722_p9 = por %p1721_p8, %p1720_p7 }
  0x31   : > { %p1716_p4 = pneg %p1715_p2 }
  0x32   : > { %1539 = dma.hbm_to_vmem [thread:$0]  (!%p2132_p5), %s2532_s3, 512, %s294_s23, [#allocation11], %s2493_s28, %s2493_s28, %s2495_s29  }
  0x33   : > { %p1723_p10 = pnand %p1722_p9, %p1716_p4 }
  0x35   : > { %1726 = shalt.err (!%p1723_p10)
}
  0x36   : > { %s2533_s5 = sld [smem:[#allocation38_spill]]  ;;  %s1386_s9 = sadd.s32 4294967294, %s1995_s19  }
  0x37   : > { %s39_s16 = sadd.s32 1, %s1987_s17  ;;  %s42_s23 = sadd.s32 1, %s1991_s18 }
  0x38   : > { %p40_p11 = scmp.ge.s32.totalorder %s39_s16, 2  ;;  %s49_s22 = sadd.s32 1, %s1975_s14 }
  0x39   : > { %p2500_p12 = scmp.ne.s32.totalorder %s1975_s14, %s1971_s13  ;;  %p57_p13 = scmp.eq.s32.totalorder %s1995_s19, 0 }
  0x3a   : > { %s2591_s16 = smov (%p40_p11, %s39_s16), 0  ;;  %s2593_s23 = smov (!%p40_p11, %s42_s23), %s1991_s18 }
  0x3b   : > { %2534 = sst [smem:[#allocation28_spill]] %s2591_s16  ;;  %p2499_p0 = scmp.ne.s32.totalorder %s1971_s13, %s1967_s12 }
  0x3c   : > { %1545 = dma.hbm_to_vmem [thread:$0]  (!%p2132_p5), %s2533_s5, 512, %s320_s26, [#allocation14], %s2493_s28, %s2493_s28, %s2495_s29  }
  0x3d   : > { %p44_p2 = scmp.ge.s32.totalorder %s2593_s23, 2  ;;  %s73_s26 = ssub.s32 %s1987_s17, %s2591_s16 }
  0x3e   : > { %p2179_p4 = por %p57_p13, %p2500_p12  ;;  %p2188_p7 = por %p2513_p1, %p2499_p0 }
  0x3f   : > { %s2595_s23 = smov (%p44_p2, %s2593_s23), 0  ;;  %s77_s28 = sadd.s32 1, %s1963_s11 }
  0x40   : > { %s2536_s27 = scalar_select %p2188_p7, 1, 0 }
  0x41   : > { %2537 = sst [smem:[#allocation29_spill]] %s2595_s23  ;;  %p84_p8 = scmp.ne.s32.totalorder %s1963_s11, %s1959_s10 }
  0x42   : > { %s46_s29 = ssub.s32 %s1991_s18, %s2595_s23  ;;  %p90_p9 = scmp.ne.s32.totalorder %s1959_s10, %s1955_s30 }
  0x43   : > { %p47_p10 = scmp.eq.s32.totalorder %s46_s29, 0  ;;  %s74_s3 = sor.u32 %s73_s26, %s46_s29 }
  0x44   : > { %p75_p11 = scmp.eq.s32.totalorder %s74_s3, 0  ;;  %p2203_p6 = por %p84_p8, %p57_p13 }
  0x45   : > { %s2208_s16 = scalar_select %p47_p10, %s1975_s14, %s49_s22  }
  0x46   : > { %s2211_s8 = scalar_select %p75_p11, %s1963_s11, %s77_s28  }
  0x47   : > { %2539 = sst [smem:[#allocation30_spill]] %s2208_s16  ;;  %p2215_p2 = por %p90_p9, %p2513_p1 }
  0x48   : > { %2540 = sst [smem:[#allocation31_spill]] %s2211_s8  ;;  %p268_p0 = scmp.eq.s32.totalorder %s2119_s20, 3 }
  0x49   : > { %s2541_s7 = scalar_select %p2215_p2, 1, 0 }
  0x4a   : > { %p274_p12 = scmp.eq.s32.totalorder %s1386_s9, 3  ;;  %p1567_p7 = scmp.lt.s32.totalorder %s1995_s19, 4 }
  0x4b   : > { %2542 = sst [smem:[#allocation32_spill]] %s2541_s7  ;;  %p2543_p3 = scmp.ne.s32.totalorder %s1975_s14, %s1971_s13 }
  0x4c   : > { %s373_s30 = sand.u32 1, %s1995_s19   ;;  %p2546_p8 = scmp.ne.s32.totalorder %s1971_s13, %s1967_s12 }
  0x4d   : > { %p2224_p13 = por %p268_p0, %p2543_p3  ;;  %p2240_p9 = pnand %p1567_p7, %p2179_p4 }
  0x4e   : > { %p2232_p10 = por %p274_p12, %p2546_p8  ;;  %s375_s9 = sand.u32 1, %s1963_s11  }
  0x4f   : > { %s2544_s3 = scalar_select %p2224_p13, 1, 0 }
  0x50   : > { %s2547_s28 = scalar_select %p2232_p10, 1, 0 }
  0x51   : > { %2545 = sst [smem:[#allocation33_spill]] %s2544_s3  ;;  %s1396_s22 = sshll.u32 %s375_s9, 3 }
  0x52   : > { %2548 = sst [smem:[#allocation34_spill]] %s2547_s28  ;;  %s1397_s26 = sshll.u32 %s1991_s18, 1 }
  0x53   : > { %s382_s23 = sadd.s32 %s1987_s17, %s1397_s26  ;;  %s377_s16 = scalar_lea.vmem [#allocation7], %s1396_s22 }
  0x54   : > { %s386_s8 = sshll.u32 %s377_s16, 4  ;;  %s1398_s15 = sshll.u32 %s382_s23, 7  ;;  %s387_s8 = int_to_ptr.vmem [resolvable:$true] %s386_s8 }
  0x55   : > { %s2550_s1 = sld [smem:[#allocation35_spill]]  ;;  %p2254_p3 = pnand %p1567_p7, %p2203_p6 }
  0x56   : > { %s1399_s11 = sshll.u32 %s375_s9, 7  ;;  %s2259_s10 = scalar_lea.sflag [#allocation8], %s373_s30 }
  0x57   : > { %p2514_p12 = pneg %p2254_p3  ;;  %s1740_s16 = scalar_lea.vmem %s387_s8, 128 }
  0x58   : > { %p1741_p0 = scmp.ne.s32.totalorder %s387_s8, %s1740_s16  ;;  %s2001_s5 = smov [#allocation7]  }
  0x59   : > { %s1745_s12 = sshll.u32 %s2001_s5, 4  ;;  %s1746_s12 = int_to_ptr.vmem [resolvable:$false] %s1745_s12 }
  0x5a   : > { %p1743_p4 = pnand %p1741_p0, %p2514_p12  ;;  %p1748_p6 = scmp.lt.s32.totalorder %s387_s8, %s1746_s12 }
  0x5b   : > { %s384_s7 = scalar_lea.hbm %s2550_s1, %s1398_s15  ;;  %s1747_s15 = scalar_lea.vmem %s1746_s12, 256 }
  0x5c   : > { %p1744_p11 = pneg %p1743_p4  ;;  %p1749_p7 = scmp.lt.s32.totalorder %s1747_s15, %s1740_s16 }
  0x5e   : > { %p1750_p8 = por %p1749_p7, %p1748_p6 }
  0x60   : > { %p1751_p1 = pnand %p1750_p8, %p1744_p11 }
  0x62   : > { %1754 = shalt.err (!%p1751_p1)
}
  0x63   : > { %1555 = dma.hbm_to_vmem [thread:$0]  (!%p2254_p3), %s384_s7, 128, %s387_s8, %s2259_s10  }
  0x64   : > { %s397_s23 = scalar_lea.vmem [#allocation9], %s1399_s11  ;;  %s2002_s30 = smov [#allocation12]  }
  0x65   : > { %s407_s3 = sshll.u32 %s397_s23, 4  ;;  %s306_s9 = sshll.u32 %s2002_s30, 4  ;;  %s2269_s3 = int_to_ptr.vmem [resolvable:$true] %s407_s3  ;;  %s307_s9 = int_to_ptr.vmem [resolvable:$true] %s306_s9 }
  0x66   : > { %s1766_s22 = scalar_lea.vmem %s307_s9, 512  ;;  %p2552_p4 = pneg %p2132_p5 }
  0x67   : > { %p1767_p0 = scmp.ne.s32.totalorder %s307_s9, %s1766_s22  ;;  %p1774_p11 = scmp.lt.s32.totalorder %s307_s9, %s307_s9 }
  0x68   : > { %p1775_p1 = scmp.lt.s32.totalorder %s1766_s22, %s1766_s22 }
  0x69   : > { %p1769_p12 = pnand %p1767_p0, %p2552_p4 }
  0x6a   : > { %p1776_p7 = por %p1775_p1, %p1774_p11 }
  0x6b   : > { %p1770_p6 = pneg %p1769_p12 }
  0x6d   : > { %p1777_p8 = pnand %p1776_p7, %p1770_p6 }
  0x6f   : > { %1780 = shalt.err (!%p1777_p8)
}
  0x70   : > { %s2553_s7 = smov 8   ;;  %s2554_s8 = smov 128  }
  0x71   : > { %s2555_s4 = sld [smem:[#allocation37_spill]]  ;;  %s2003_s16 = smov [#allocation15]  }
  0x72   : > { %s332_s5 = sshll.u32 %s2003_s16, 4  ;;  %s352_s12 = sand.u32 1, %s1975_s14   ;;  %s333_s5 = int_to_ptr.vmem [resolvable:$true] %s332_s5 }
  0x73   : > { %s1792_s15 = scalar_lea.vmem %s333_s5, 512  ;;  %p2556_p0 = pmov %p2552_p4 }
  0x74   : > { %p1793_p12 = scmp.ne.s32.totalorder %s333_s5, %s1792_s15  ;;  %p1800_p11 = scmp.lt.s32.totalorder %s333_s5, %s333_s5 }
  0x75   : > { %p1801_p1 = scmp.lt.s32.totalorder %s1792_s15, %s1792_s15 }
  0x76   : > { %p1795_p4 = pnand %p1793_p12, %p2556_p0 }
  0x77   : > { %1542 = dma.hbm_to_vmem [thread:$0]  (!%p2132_p5), %s2555_s4, 512, %s307_s9, [#allocation11], %s2554_s8, %s2554_s8, %s2553_s7  }
  0x78   : > { %p1796_p6 = pneg %p1795_p4  ;;  %p1802_p7 = por %p1801_p1, %p1800_p11 }
  0x7a   : > { %p1803_p8 = pnand %p1802_p7, %p1796_p6 }
  0x7c   : > { %1806 = shalt.err (!%p1803_p8)
}
  0x7d   : > { %s2557_s6 = sld [smem:[#allocation39_spill]]  ;;  %s1393_s9 = sshll.u32 %s352_s12, 4 }
  0x7e   : > { %s1433_s22 = sshll.u32 %s1991_s18, 8  ;;  %s356_s15 = scalar_lea.vmem [#allocation4], %s1393_s9 }
  0x7f   : > { %s362_s16 = scalar_lea.hbm %s2482_s0, %s1433_s22  ;;  %s363_s28 = sshll.u32 %s356_s15, 4  ;;  %s364_s28 = int_to_ptr.vmem [resolvable:$true] %s363_s28 }
  0x80   : > { %s1402_s24 = sshll.u32 %s1991_s18, 5  ;;  %s2558_s1 = sshll.u32 %s1987_s17, 4 }
  0x81   : > { %s404_s4 = sadd.s32 %s2558_s1, %s1402_s24  ;;  %s353_s14 = scalar_lea.sflag [#allocation5], %s352_s12 }
  0x82   : > { %p1809_p12 = pneg %p2240_p9  ;;  %s1820_s23 = scalar_lea.vmem %s364_s28, 256 }
  0x83   : > { %1548 = dma.hbm_to_vmem [thread:$0]  (!%p2132_p5), %s2557_s6, 512, %s333_s5, [#allocation14], %s2554_s8, %s2554_s8, %s2553_s7  }
  0x84   : > { %p1821_p0 = scmp.ne.s32.totalorder %s364_s28, %s1820_s23  ;;  %s2004_s5 = smov [#allocation4]  }
  0x85   : > { %s1825_s30 = sshll.u32 %s2004_s5, 4  ;;  %s1826_s30 = int_to_ptr.vmem [resolvable:$false] %s1825_s30 }
  0x86   : > { %p1823_p4 = pnand %p1821_p0, %p1809_p12  ;;  %s1827_s6 = scalar_lea.vmem %s1826_s30, 512 }
  0x87   : > { %p1828_p5 = scmp.lt.s32.totalorder %s364_s28, %s1826_s30  ;;  %p1829_p11 = scmp.lt.s32.totalorder %s1827_s6, %s1820_s23 }
  0x88   : > { %p1824_p6 = pneg %p1823_p4 }
  0x89   : > { %p1830_p1 = por %p1829_p11, %p1828_p5 }
  0x8b   : > { %p1831_p7 = pnand %p1830_p1, %p1824_p6 }
  0x8d   : > { %1834 = shalt.err (!%p1831_p7)
}
  0x8e   : > { %1552 = dma.hbm_to_vmem [thread:$0]  (!%p2240_p9), %s362_s16, 256, %s364_s28, %s353_s14, %s2554_s8, %s2554_s8, %s2553_s7  }
  0x8f   : > { %s1403_s1 = sshll.u32 %s404_s4, 7  ;;  %s1848_s11 = scalar_lea.vmem %s2269_s3, 2048 }
  0x90   : > { %s406_s22 = scalar_lea.hbm %s2484_s2, %s1403_s1  ;;  %p1849_p8 = scmp.ne.s32.totalorder %s2269_s3, %s1848_s11 }
  0x91   : > { %p2559_p12 = pneg %p2254_p3  ;;  %s2005_s6 = smov [#allocation9]  }
  0x92   : > { %s1853_s29 = sshll.u32 %s2005_s6, 4  ;;  %s1854_s29 = int_to_ptr.vmem [resolvable:$false] %s1853_s29 }
  0x93   : > { %p1851_p0 = pnand %p1849_p8, %p2559_p12  ;;  %s1855_s26 = scalar_lea.vmem %s1854_s29, 4096 }
  0x94   : > { %p1856_p6 = scmp.lt.s32.totalorder %s2269_s3, %s1854_s29  ;;  %p1857_p5 = scmp.lt.s32.totalorder %s1855_s26, %s1848_s11 }
  0x95   : > { %p1852_p4 = pneg %p1851_p0 }
  0x96   : > { %p1858_p11 = por %p1857_p5, %p1856_p6 }
  0x98   : > { %p1859_p1 = pnand %p1858_p11, %p1852_p4 }
  0x9a   : > { %1862 = shalt.err (!%p1859_p1)
}
  0x9b   : > { %1558 = dma.hbm_to_vmem [thread:$0]  (!%p2254_p3), %s406_s22, 2048, %s2269_s3, %s2259_s10, %s2554_s8, %s2554_s8, %s2553_s7  }
  0x9c   : > { %p2560_p9 = scmp.ne.s32.totalorder %s2530_s21, 0 }
  0x9d   : > { %s2327_s4 = sand.u32 (!%p2560_p9), 1, %s1971_s13   ;;  %p2561_p7 = scmp.ne.s32.totalorder (!%p2560_p9), %s2536_s27, 0 }
  0x9e   : > { %419 = sbr.rel (%p2560_p9) target bundleno = 1200 (0x4b0), region = 56  ;;  %s1405_s14 = sshll.u32 (!%p2560_p9), %s2327_s4, 4 }
  0x9f   : > { %s422_s28 = scalar_lea.sflag (!%p2560_p9), [#allocation5], %s2327_s4  ;;  %s2331_s16 = scalar_lea.vmem (!%p2560_p9), [#allocation4], %s1405_s14 }
  0xa3   : > { %1934 = dma.done.wait (%p2561_p7), %s422_s28, 256  }
  0xa4   : > { %1936 = vsyncadd (%p2561_p7), %s422_s28, 4294967040  ;;  %s2562_s10 = sld [smem:[#allocation22_spill]]  ;;  %s430_s21 = sand.u32 1, %s2119_s20  }
  0xa5   : > { %s431_s8 = scalar_lea.sflag [#allocation8], %s430_s21 }
  0xaa   : > { %s432_s3 = sand.u32 1, %s2562_s10  }
  0xab   : > { %s1406_s7 = sshll.u32 %s432_s3, 3 }
  0xac   : > { %s434_s15 = scalar_lea.vmem [#allocation7], %s1406_s7 }
  0xad   : > { %1938 = dma.done.wait (%p2215_p2), %s431_s8, 2176  }
  0xae   : > { %1940 = vsyncadd (%p2215_p2), %s431_s8, 4294965120  ;;  %s1407_s24 = sshll.u32 %s432_s3, 7  ;;  %p2564_p3 = scmp.eq.s32.totalorder %s2119_s20, 0 }
  0xaf   : > { %s2343_s23 = scalar_lea.vmem [#allocation9], %s1407_s24 }
  0xb0   : > { %1942 = dma.done.wait (%p2564_p3), [#allocation11], 1024   ;;  %p2565_p8 = pmov %p2564_p3 }
  0xb1   : > { %p2566_p12 = pmov %p2564_p3 }
  0xb2   : > { %1944 = vsyncadd (%p2565_p8), [#allocation11], 4294966272 }
  0xb3   : > { %1946 = dma.done.wait (%p2566_p12), [#allocation14], 1024   ;;  %p2567_p0 = pmov %p2564_p3 }
  0xb4   : > { %s2353_s27 = scalar_lea.vmem [#allocation16], %s1405_s14  ;;  %s2568_s5 = sld [smem:[#allocation26_spill]] }
  0xb5   : > { %1948 = vsyncadd (%p2567_p0), [#allocation14], 4294966272 }
  0xba   : > { %p1413_p4 = scmp.ne.s32.totalorder %s2568_s5, 0 }
  0xbc   : > { %508 = sbr.rel (%p1413_p4) target bundleno = 196 (0xc4), region = 88 }
  0xc1   : > { %vm509_vm0 = vcmask 269312   ;;  %vm512_vm1 = vcmask 261120   ;;  %v2006_v0 = vmov 0.0  }
  0xc2   : > { %510 = vst.msk [vmem:[#allocation2] sm:$0xff] %vm509_vm0, %v2006_v0  ;;  %511 = vst.msk [vmem:[#allocation2 + $0x8] sm:$0xff] %vm509_vm0, %v2006_v0 }
  0xc3   : > { %513 = vst.msk [vmem:[#allocation3] sm:$0xff] %vm512_vm1, %v2006_v0  ;;  %514 = vst.msk [vmem:[#allocation3 + $0x8] sm:$0xff] %vm512_vm1, %v2006_v0 }
  0xc4 PF: > { %v515_v1 = vld [vmem:[%s434_s15] sm:$0xff]  ;;  %s2569_s30 = sld [smem:[#allocation26_spill]]  ;;  %v658_v2 = vlaneseq  ;;  %vm569_vm2 = vcmask 64512   ;;  %v517_v29 = vld [vmem:[%s2343_s23 + $0x8] sm:$0xff]  ;;  %vm762_vm3 = vcmask 261120   ;;  %v520_v43 = vld [vmem:[%s2343_s23 + $0x20] sm:$0xff] }
  0xc5   : > { %537 = vxpose.xlu0.b32.start.end [1/1] (short) (narrow) %v515_v1, 16  ;;  %v519_v30 = vld [vmem:[%s2343_s23 + $0x18] sm:$0xff]  ;;  %v521_v34 = vld [vmem:[%s2343_s23 + $0x28] sm:$0xff]  ;;  %v518_v40 = vld [vmem:[%s2343_s23 + $0x10] sm:$0xff]  ;;  %vm653_vm4 = vcmask 269312  }
  0xc6   : > { %v659_v3 = vshrl.u32 %v658_v2, 7  ;;  %v523_v39 = vld [vmem:[%s2343_s23 + $0x38] sm:$0xff]  ;;  %v525_v46 = vld [vmem:[%s2343_s23 + $0x48] sm:$0xff]  ;;  %v522_v50 = vld [vmem:[%s2343_s23 + $0x30] sm:$0xff] }
  0xc7   : > { %v516_v52 = vld [vmem:[%s2343_s23] sm:$0xff]  ;;  %v527_v56 = vld [vmem:[%s2343_s23 + $0x58] sm:$0xff]  ;;  %v526_v63 = vld [vmem:[%s2343_s23 + $0x50] sm:$0xff] }
  0xc8   : > { %v660_v5 = vsub.s32 0, %v659_v3  ;;  %v671_v6 = vsub.s32 1, %v659_v3  ;;  %v682_v9 = vsub.s32 2, %v659_v3  ;;  %v693_v11 = vsub.s32 3, %v659_v3  ;;  %v524_v55 = vld [vmem:[%s2343_s23 + $0x40] sm:$0xff] }
  0xc9   : > { %v704_v13 = vsub.s32 4, %v659_v3  ;;  %v715_v15 = vsub.s32 5, %v659_v3  ;;  %v726_v17 = vsub.s32 6, %v659_v3  ;;  %v737_v18 = vsub.s32 7, %v659_v3 }
  0xca   : > { %s1414_s1 = sshll.u32 %s2569_s30, 3  ;;  %v661_v7 = vrot.slane %v515_v1, %v660_v5  ;;  %v672_v8 = vrot.slane %v515_v1, %v671_v6  ;;  %v683_v10 = vrot.slane %v515_v1, %v682_v9  ;;  %v694_v12 = vrot.slane %v515_v1, %v693_v11  ;;  %v528_v5 = vld [vmem:[%s2343_s23 + $0x60] sm:$0xff]  ;;  %p1417_p2 = scmp.ne.s32.totalorder %s2569_s30, 1 }
  0xcb   : > { %s533_s20 = scalar_lea.vmem %s2331_s16, %s1414_s1 [#allocation4]  ;;  %v705_v14 = vrot.slane %v515_v1, %v704_v13  ;;  %v716_v16 = vrot.slane %v515_v1, %v715_v15  ;;  %v727_v19 = vrot.slane %v515_v1, %v726_v17  ;;  %v738_v20 = vrot.slane %v515_v1, %v737_v18  ;;  %v529_v18 = vld [vmem:[%s2343_s23 + $0x68] sm:$0xff]  ;;  %s2570_s22 = sld [smem:[#allocation40_spill]] (!%p1417_p2) }
  0xcc   : > { %v534_v4 = vld [vmem:[%s533_s20] sm:$0xff]  ;;  %667 = vbcast.lane.b32.xlu1 %v661_v7, 264  ;;  %s2571_s29 = sld [smem:[#allocation41_spill]] (!%p1417_p2)  ;;  %s2008_s26 = smov (!%p1417_p2), 32  }
  0xcd   : > { %1463 = vmatprep.subr.mxu0 %v534_v4  ;;  %s2009_s14 = smov (!%p1417_p2), 96  }
  0xce   : > { %1464 = vmatpush3.msra.mxu0 %v534_v4 }
  0xd0   : > { %674 = vbcast.lane.b32.xlu1 %v672_v8, 256 }
  0xd4   : > { %678 = vbcast.lane.b32.xlu1 %v672_v8, 264 }
  0xd8   : > { %685 = vbcast.lane.b32.xlu1 %v683_v10, 256 }
  0xdc   : > { %689 = vbcast.lane.b32.xlu1 %v683_v10, 264 }
  0xe0   : > { %696 = vbcast.lane.b32.xlu1 %v694_v12, 256 }
  0xe4   : > { %700 = vbcast.lane.b32.xlu1 %v694_v12, 264  ;;  %v530_v12 = vld [vmem:[%s2343_s23 + $0x70] sm:$0xff] }
  0xe8   : > { %707 = vbcast.lane.b32.xlu1 %v705_v14, 256 }
  0xec   : > { %711 = vbcast.lane.b32.xlu1 %v705_v14, 264 }
  0xf0   : > { %718 = vbcast.lane.b32.xlu1 %v716_v16, 256 }
  0xf2   : > { %663 = vbcast.lane.b32.xlu0 %v661_v7, 256 }
  0xf4   : > { %722 = vbcast.lane.b32.xlu1 %v716_v16, 264 }
  0xf6   : > { %740 = vbcast.lane.b32.xlu0 %v738_v20, 256 }
  0xf8   : > { %729 = vbcast.lane.b32.xlu1 %v727_v19, 256 }
  0xfc   : > { %733 = vbcast.lane.b32.xlu1 %v727_v19, 264 }
 0x100   : > { %744 = vbcast.lane.b32.xlu1 %v738_v20, 264 }
 0x13e   : > { %v668_v21 = vpop.permute.xlu1 %667 }
 0x13f   : > { %v747_v32 = vmul.f32 %v668_v21, %v517_v29 }
 0x141   : > { %v553_v22 = vpop.trf.xlu0  ;;  %v778_v36 = vsel %vm762_vm3, %v747_v32, 0.0 }
 0x142   : > { %1465 = vmatprep.mubr.msk.f32.mxu0 %vm569_vm2, %v553_v22  ;;  %v675_v23 = vpop.permute.xlu1 %674 }
 0x143   : > { %v748_v47 = vmul.f32 %v675_v23, %v518_v40 }
 0x145   : > { %v554_v24 = vpop.trf.xlu0  ;;  %v764_v58 = vsel %vm762_vm3, %v748_v47, 0.0 }
 0x146   : > { %1466 = vmatmul.mubr.msk.f32.vlgmr.msra.gmra.mxu0 %vm569_vm2, %v554_v24  ;;  %v679_v25 = vpop.permute.xlu1 %678 }
 0x147   : > { %v749_v33 = vmul.f32 %v679_v25, %v519_v30 }
 0x149   : > { %v779_v37 = vsel %vm762_vm3, %v749_v33, 0.0 }
 0x14a   : > { %v686_v26 = vpop.permute.xlu1 %685  ;;  %v780_v41 = vadd.f32 %v779_v37, %v778_v36  ;;  %v657_v36 = vld [vmem:[#allocation3 + $0x8] sm:$0xff] }
 0x14b   : > { %v750_v48 = vmul.f32 %v686_v26, %v520_v43  ;;  %v531_v26 = vld [vmem:[%s2343_s23 + $0x78] sm:$0xff]  ;;  %v535_v43 = vld [vmem:[#allocation2] sm:$0xff] }
 0x14d   : > { %v766_v61 = vsel %vm762_vm3, %v750_v48, 0.0 }
 0x14e   : > { %v690_v27 = vpop.permute.xlu1 %689 }
 0x14f   : > { %v751_v38 = vmul.f32 %v690_v27, %v521_v34  ;;  %v656_v34 = vld [vmem:[#allocation3] sm:$0xff] }
 0x151   : > { %v781_v44 = vsel %vm762_vm3, %v751_v38, 0.0 }
 0x152   : > { %v697_v28 = vpop.permute.xlu1 %696  ;;  %v782_v49 = vadd.f32 %v781_v44, %v780_v41  ;;  %v536_v41 = vld [vmem:[#allocation2 + $0x8] sm:$0xff] }
 0x153   : > { %v752_v59 = vmul.f32 %v697_v28, %v522_v50 }
 0x155   : > { %v768_v7 = vsel %vm762_vm3, %v752_v59, 0.0 }
 0x156   : > { %v701_v31 = vpop.permute.xlu1 %700 }
 0x157   : > { %v753_v45 = vmul.f32 %v701_v31, %v523_v39 }
 0x159   : > { %v783_v53 = vsel %vm762_vm3, %v753_v45, 0.0 }
 0x15a   : > { %v708_v35 = vpop.permute.xlu1 %707  ;;  %v784_v62 = vadd.f32 %v783_v53, %v782_v49 }
 0x15b   : > { %v754_v1 = vmul.f32 %v708_v35, %v524_v55 }
 0x15d   : > { %v770_v14 = vsel %vm762_vm3, %v754_v1, 0.0 }
 0x15e   : > { %v712_v42 = vpop.permute.xlu1 %711 }
 0x15f   : > { %v755_v54 = vmul.f32 %v712_v42, %v525_v46 }
 0x161   : > { %v785_v2 = vsel %vm762_vm3, %v755_v54, 0.0 }
 0x162   : > { %v719_v51 = vpop.permute.xlu1 %718  ;;  %v786_v9 = vadd.f32 %v785_v2, %v784_v62 }
 0x163   : > { %v756_v8 = vmul.f32 %v719_v51, %v526_v63 }
 0x164   : > { %v664_v57 = vpop.permute.xlu0 %663 }
 0x165   : > { %v746_v60 = vmul.f32 %v664_v57, %v516_v52  ;;  %v772_v19 = vsel %vm762_vm3, %v756_v8, 0.0 }
 0x166   : > { %v723_v0 = vpop.permute.xlu1 %722 }
 0x167   : > { %v757_v3 = vmul.f32 %v723_v0, %v527_v56  ;;  %v763_v4 = vsel %vm762_vm3, %v746_v60, 0.0 }
 0x168   : > { %v765_v6 = vadd.f32 %v764_v58, %v763_v4  ;;  %v741_v13 = vpop.permute.xlu0 %740 }
 0x169   : > { %v787_v15 = vsel %vm762_vm3, %v757_v3, 0.0  ;;  %v760_v20 = vmul.f32 %v741_v13, %v530_v12 }
 0x16a   : > { %v730_v10 = vpop.permute.xlu1 %729  ;;  %v767_v11 = vadd.f32 %v766_v61, %v765_v6  ;;  %v788_v21 = vadd.f32 %v787_v15, %v786_v9 }
 0x16b   : > { %v758_v16 = vmul.f32 %v730_v10, %v528_v5  ;;  %v776_v29 = vsel %vm762_vm3, %v760_v20, 0.0 }
 0x16c   : > { %v769_v17 = vadd.f32 %v768_v7, %v767_v11 }
 0x16d   : > { %v774_v24 = vsel %vm762_vm3, %v758_v16, 0.0 }
 0x16e   : > { %v734_v22 = vpop.permute.xlu1 %733  ;;  %v771_v23 = vadd.f32 %v770_v14, %v769_v17 }
 0x16f   : > { %v759_v25 = vmul.f32 %v734_v22, %v529_v18 }
 0x170   : > { %v773_v27 = vadd.f32 %v772_v19, %v771_v23 }
 0x171   : > { %v789_v28 = vsel %vm762_vm3, %v759_v25, 0.0 }
 0x172   : > { %v790_v30 = vadd.f32 %v789_v28, %v788_v21  ;;  %v745_v31 = vpop.permute.xlu1 %744  ;;  %v775_v32 = vadd.f32 %v774_v24, %v773_v27 }
 0x173   : > { %v761_v33 = vmul.f32 %v745_v31, %v531_v26 }
 0x174   : > { %v777_v35 = vadd.f32 %v776_v29, %v775_v32 }
 0x175   : > { %v791_v37 = vsel %vm762_vm3, %v761_v33, 0.0 }
 0x176   : > { %v792_v38 = vadd.f32 %v791_v37, %v790_v30  ;;  %v793_v39 = vadd.f32 %v777_v35, %v656_v34 }
 0x178   : > { %v794_v40 = vadd.f32 %v792_v38, %v657_v36  ;;  %795 = vst.msk [vmem:[#allocation3] sm:$0xff] %vm762_vm3, %v793_v39 }
 0x17a   : > { %796 = vst.msk [vmem:[#allocation3 + $0x8] sm:$0xff] %vm762_vm3, %v794_v40 }
 0x206   : > { %v1467_v42 = vpop.f32.mrf.mxu0 }
 0x207   : > { %v652_v44 = vadd.f32 %v1467_v42, %v536_v41  ;;  %800 = sbr.rel (%p1417_p2) target bundleno = 1175 (0x497), region = 92 }
 0x208   : > { %v642_v45 = vpop.f32.mrf.mxu0 }
 0x209   : > { %655 = vst.msk [vmem:[#allocation2 + $0x8] sm:$0xff] %vm653_vm4, %v652_v44  ;;  %v651_v46 = vadd.f32 %v642_v45, %v535_v43 }
 0x20b   : > { %654 = vst.msk [vmem:[#allocation2] sm:$0xff] %vm653_vm4, %v651_v46 }
 0x20c   : > { %v806_v47 = vld [vmem:[#allocation13 + $0x18] sm:$0xff]  ;;  %v805_v48 = vld [vmem:[#allocation13 + $0x10] sm:$0xff]  ;;  %v2007_v51 = vmov 32   ;;  %v804_v52 = vld [vmem:[#allocation13 + $0x8] sm:$0xff] }
 0x20d   : > { %1468 = vmatprep.subr.mxu0 %v806_v47  ;;  %v899_v49 = vld [vmem:[#allocation12 + $0x18] sm:$0xff]  ;;  %v801_v50 = vld [vmem:[%s2331_s16] sm:$0xff]  ;;  %1674 = vset.pattern.permute.xlu0 %v2007_v51  ;;  %v897_v55 = vld [vmem:[#allocation12 + $0x8] sm:$0xff] }
 0x20e   : > { %1469 = vmatpush3.msra.mxu0 %v806_v47  ;;  %1479 = vmatprep.subr.mxu1 %v899_v49  ;;  %v898_v53 = vld [vmem:[#allocation12 + $0x10] sm:$0xff]  ;;  %v803_v54 = vld [vmem:[#allocation13] sm:$0xff]  ;;  %v802_v56 = vld [vmem:[%s2331_s16 + $0x8] sm:$0xff] }
 0x20f   : > { %1470 = vmatprep.subr.mxu0 %v805_v48  ;;  %1476 = vmatprep.mubr.msk.f32.mxu0 %vm762_vm3, %v801_v50  ;;  %v893_v57 = vld [vmem:[#allocation10 + $0x18] sm:$0xff]  ;;  %v896_v58 = vld [vmem:[#allocation12] sm:$0xff]  ;;  %v892_v59 = vld [vmem:[#allocation10 + $0x10] sm:$0xff] }
 0x210   : > { %1471 = vmatpush3.msra.mxu0 %v805_v48  ;;  %1480 = vmatpush3.msra.mxu1 %v899_v49  ;;  %v894_v60 = vld [vmem:[#allocation3] sm:$0xff]  ;;  %v891_v61 = vld [vmem:[#allocation10 + $0x8] sm:$0xff]  ;;  %v889_v1 = vld [vmem:[#allocation2 + $0x8] sm:$0xff] }
 0x211   : > { %1472 = vmatprep.subr.mxu0 %v804_v52  ;;  %1481 = vmatprep.subr.mxu1 %v898_v53  ;;  %v895_v62 = vld [vmem:[#allocation3 + $0x8] sm:$0xff]  ;;  %v890_v0 = vld [vmem:[#allocation10] sm:$0xff]  ;;  %v1086_v2 = vld [vmem:[#allocation15 + $0x18] sm:$0xff] }
 0x212   : > { %1473 = vmatpush3.msra.mxu0 %v804_v52  ;;  %1482 = vmatpush3.msra.mxu1 %v898_v53  ;;  %v888_v63 = vld [vmem:[#allocation2] sm:$0xff]  ;;  %v1084_v4 = vld [vmem:[#allocation15 + $0x8] sm:$0xff]  ;;  %v1083_v5 = vld [vmem:[#allocation15] sm:$0xff] }
 0x213   : > { %1474 = vmatprep.subr.mxu0 %v803_v54  ;;  %1483 = vmatprep.subr.mxu1 %v897_v55  ;;  %v1085_v3 = vld [vmem:[#allocation15 + $0x10] sm:$0xff] }
 0x214   : > { %1475 = vmatpush3.msra.mxu0 %v803_v54  ;;  %1484 = vmatpush3.msra.mxu1 %v897_v55  ;;  %v1424_v8 = vld [vmem:[%s2570_s22] ss:$0 sm:$0xff] }
 0x215   : > { %1477 = vmatmul.mubr.msk.f32.vlgmr.msra.gmra.mxu0 %vm762_vm3, %v802_v56  ;;  %1490 = vmatprep.subr.mxu0 %v893_v57  ;;  %v1427_v23 = vld [vmem:[%s2571_s29] ss:$0 sm:$0xff] }
 0x216   : > { %1491 = vmatpush3.msra.mxu0 %v893_v57  ;;  %1485 = vmatprep.subr.mxu1 %v896_v58 }
 0x217   : > { %1492 = vmatprep.subr.mxu0 %v892_v59  ;;  %1486 = vmatpush3.msra.mxu1 %v896_v58 }
 0x218   : > { %1493 = vmatpush3.msra.mxu0 %v892_v59  ;;  %1487 = vmatprep.mubr.msk.f32.mxu1 %vm762_vm3, %v894_v60 }
 0x219   : > { %1494 = vmatprep.subr.mxu0 %v891_v61  ;;  %1488 = vmatmul.mubr.msk.f32.vlgmr.msra.gmra.mxu1 %vm762_vm3, %v895_v62 }
 0x21a   : > { %1495 = vmatpush3.msra.mxu0 %v891_v61  ;;  %1498 = vmatprep.mubr.msk.f32.mxu0 %vm762_vm3, %v888_v63 }
 0x21b   : > { %1496 = vmatprep.subr.mxu0 %v890_v0  ;;  %1072 = vperm.xlu0 %1674, %v888_v63  }
 0x21c   : > { %1497 = vmatpush3.msra.mxu0 %v890_v0  ;;  %1501 = vmatprep.subr.mxu1 %v1086_v2 }
 0x21d   : > { %1499 = vmatmul.mubr.msk.f32.vlgmr.msra.gmra.mxu0 %vm762_vm3, %v889_v1  ;;  %1502 = vmatpush3.msra.mxu1 %v1086_v2 }
 0x21e   : > { %1503 = vmatprep.subr.mxu1 %v1085_v3 }
 0x21f   : > { %1076 = vperm.xlu0 %1674, %v889_v1   ;;  %1504 = vmatpush3.msra.mxu1 %v1085_v3 }
 0x220   : > { %1505 = vmatprep.subr.mxu1 %v1084_v4 }
 0x221   : > { %1506 = vmatpush3.msra.mxu1 %v1084_v4 }
 0x222   : > { %1507 = vmatprep.subr.mxu1 %v1083_v5 }
 0x223   : > { %1508 = vmatpush3.msra.mxu1 %v1083_v5  ;;  %1184 = vrot.lane.b32.xlu0 %v1427_v23, %s2008_s26 }
 0x296   : > { %v1073_v7 = vpop.permute.xlu0 %1072 }
 0x29a   : > { %v1077_v14 = vpop.permute.xlu0 %1076 }
 0x29e   : > { %v1185_v27 = vpop.permute.xlu0 %1184 }
 0x2d5   : > { %v1478_v6 = vpop.f32.mrf.mxu0 }
 0x2d6   : > { %v1070_v12 = vadd.f32 %v1478_v6, %v1424_v8 }
 0x2d7   : > { %v879_v9 = vpop.f32.mrf.mxu0 }
 0x2d8   : > { %v1069_v11 = vadd.f32 %v1424_v8, %v879_v9  ;;  %v1080_v20 = vmul.f32 %v1077_v14, %v1070_v12 }
 0x2d9   : > { %v1489_v10 = vpop.f32.mrf.mxu1 }
 0x2da   : > { %v1079_v18 = vmul.f32 %v1073_v7, %v1069_v11 }
 0x2db   : > { %v972_v15 = vpop.f32.mrf.mxu1 }
 0x2dd   : > { %v1500_v13 = vpop.f32.mrf.mxu0 }
 0x2de   : > { %v1059_v16 = vadd.f32 %v1500_v13, %v1489_v10 }
 0x2df   : > { %v1053_v17 = vpop.f32.mrf.mxu0 }
 0x2e0   : > { %v1054_v19 = vadd.f32 %v1053_v17, %v972_v15  ;;  %v1082_v22 = vadd.f32 %v1080_v20, %v1059_v16 }
 0x2e2   : > { %v1081_v21 = vadd.f32 %v1079_v18, %v1054_v19 }
 0x2e4   : > { %1509 = vmatprep.mubr.msk.f32.mxu1 %vm762_vm3, %v1081_v21 }
 0x2e5   : > { %1510 = vmatmul.mubr.msk.f32.vlgmr.msra.gmra.mxu1 %vm762_vm3, %v1082_v22 }
 0x3a5   : > { %v1511_v24 = vpop.f32.mrf.mxu1 }
 0x3a7   : > { %v1159_v25 = vpop.f32.mrf.mxu1 }
 0x3a8   : > { %1170 = vrot.lane.b32.xlu1 %v1159_v25, %s2008_s26 }
 0x3ac   : > { %1172 = vrot.lane.b32.xlu1 %v1511_v24, %s2008_s26 }
 0x41a   : > { %v1171_v26 = vpop.permute.xlu1 %1170 }
 0x41b   : > { %v1176_v28 = vadd.f32 %v1171_v26, %v879_v9 }
 0x41d   : > { %v1187_v29 = vadd.f32 %v1185_v27, %v1176_v28 }
 0x41e   : > { %v1173_v30 = vpop.permute.xlu1 %1172 }
 0x41f   : > { %v1177_v31 = vadd.f32 %v1478_v6, %v1173_v30  ;;  %1191 = vrot.lane.b32.xlu1 %v1187_v29, %s2009_s14 }
 0x421   : > { %v1188_v32 = vadd.f32 %v1185_v27, %v1177_v31 }
 0x423   : > { %1193 = vrot.lane.b32.xlu0 %v1188_v32, %s2009_s14 }
 0x491   : > { %v1192_v33 = vpop.permute.xlu1 %1191 }
 0x492   : > { %1197 = vst.msk [vmem:[%s2353_s27] sm:$0xff] %vm762_vm3, %v1192_v33 }
 0x495   : > { %v1194_v34 = vpop.permute.xlu0 %1193 }
 0x496   : > { %1198 = vst.msk [vmem:[%s2353_s27 + $0x8] sm:$0xff] %vm762_vm3, %v1194_v34 }
 0x497 PF: > { %s2572_s28 = sld [smem:[#allocation27_spill]]  ;;  %s1213_s8 = sshll.u32 %s2353_s27, 4  ;;  %s2420_s8 = int_to_ptr.vmem [resolvable:$true] %s1213_s8 }
 0x498   : > { %s2574_s3 = sld [smem:[#allocation42_spill]]  ;;  %s1200_s15 = scalar_lea.sflag [#allocation6], %s2327_s4 }
 0x499   : > { %s1863_s24 = scalar_lea.vmem %s2420_s8, 256  ;;  %s2010_s23 = smov [#allocation16]  }
 0x49a   : > { %p1864_p6 = scmp.ne.s32.totalorder %s2420_s8, %s1863_s24  ;;  %s1867_s5 = sshll.u32 %s2010_s23, 4  ;;  %s1868_s5 = int_to_ptr.vmem [resolvable:$false] %s1867_s5 }
 0x49b   : > { %s1869_s30 = scalar_lea.vmem %s1868_s5, 512  ;;  %p1870_p1 = scmp.lt.s32.totalorder %s2420_s8, %s1868_s5 }
 0x49c   : > { %p1865_p5 = pnand %p1864_p6, %p2224_p13  ;;  %p1871_p9 = scmp.lt.s32.totalorder %s1869_s30, %s1863_s24 }
 0x49d   : > { %s1435_s10 = sshll.u32 %s2572_s28, 8 }
 0x49e   : > { %s2417_s7 = scalar_lea.hbm %s2574_s3, %s1435_s10  ;;  %p1866_p11 = pneg %p1865_p5 }
 0x49f   : > { %p1872_p7 = por %p1871_p9, %p1870_p1 }
 0x4a1   : > { %p1873_p3 = pnand %p1872_p7, %p1866_p11 }
 0x4a3   : > { %1876 = shalt.err (!%p1873_p3)
}
 0x4a4   : > { %s1877_s27 = scalar_lea.hbm %s2417_s7, 256  ;;  %s1881_s12 = scalar_lea.hbm %s2574_s3, 512 }
 0x4a5   : > { %p1878_p8 = scmp.ne.s32.totalorder %s2417_s7, %s1877_s27  ;;  %p1882_p4 = scmp.lt.s32.totalorder %s2417_s7, %s2574_s3 }
 0x4a6   : > { %p1883_p2 = scmp.lt.s32.totalorder %s1881_s12, %s1877_s27 }
 0x4a7   : > { %p1879_p12 = pnand %p1878_p8, %p2224_p13 }
 0x4a8   : > { %p1884_p6 = por %p1883_p2, %p1882_p4 }
 0x4a9   : > { %p1880_p0 = pneg %p1879_p12 }
 0x4ab   : > { %p1885_p5 = pnand %p1884_p6, %p1880_p0 }
 0x4ad   : > { %1888 = shalt.err (!%p1885_p5)
}
 0x4ae   : > { %s2011_s11 = smov 128   ;;  %s2012_s6 = smov 8  }
 0x4af   : > { %1534 = dma.vmem_to_hbm [thread:$0]  (%p2224_p13), %s2420_s8, 256, %s2417_s7, %s1200_s15, %s2011_s11, %s2011_s11, %s2012_s6  }
 0x4b0 PF: > { %s2575_s29 = sld [smem:[#allocation24_spill]]  ;;  %p1572_p11 = scmp.ge.s32.totalorder %s1995_s19, 2 }
 0x4b2   : > { %p1560_p1 = pnand %p1572_p11, %p2232_p10 }
 0x4b4   : > { %p1561_p9 = pneg %p1560_p1 }
 0x4b6   : > { %s1228_s14 = sand.u32 1, %s2575_s29  }
 0x4b7   : > { %s1229_s28 = scalar_lea.sflag [#allocation6], %s1228_s14 }
 0x4b8   : > { %1950 = dma.done.wait (%p1561_p9), %s1229_s28, 256  }
 0x4b9   : > { %1952 = vsyncadd (%p1561_p9), %s1229_s28, 4294967040  ;;  %s30_s19 = sadd.s32 1, %s1995_s19   ;;  %s2577_s30 = sld [smem:[#allocation22_spill]] }
 0x4ba   : > { %p27_p7 = scmp.ge.s32.totalorder %s30_s19, 6   ;;  %s2578_s10 = sld [smem:[#allocation23_spill]] }
 0x4bb   : > { %s2579_s11 = sld [smem:[#allocation31_spill]]  ;;  %s2584_s12 = smov %s1971_s13 }
 0x4bc   : > { %s2580_s4 = sld [smem:[#allocation25_spill]]  ;;  %s2586_s15 = smov %s1987_s17 }
 0x4bd   : > { %s2581_s14 = sld [smem:[#allocation30_spill]]  ;;  %s2587_s16 = smov %s1991_s18 }
 0x4be   : > { %s2582_s25 = sld [smem:[#allocation28_spill]] }
 0x4bf   : > { %s2583_s21 = sld [smem:[#allocation29_spill]] }
 0x4c1   :  { %29 = sbr.rel (!%p27_p7) target bundleno = 22 (0x16), region = 150 }
 0x4c2   : > { %s2585_s13 = smov %s2580_s4 }
 0x4c4   : > { %s2588_s17 = smov %s2582_s25 }
 0x4c5   : > { %s2589_s18 = smov %s2583_s21 }
 0x4c6   :  { %1234 = vsyncpa [#allocation5], 1 }
 0x4c7   :  { %1236 = vsyncpa [#allocation5 + $0x1], 1 }
 0x4c8   :  { %1237 = vsyncpa [#allocation8], 1 }
 0x4c9   :  { %1239 = vsyncpa [#allocation8 + $0x1], 1 }
 0x4ca   :  { %1240 = vsyncpa [#allocation11], 1 }
 0x4cb   :  { %1241 = vsyncpa [#allocation14], 1 }
 0x4cc   :  { %1242 = vsyncpa [#allocation6], 1 }
 0x4cd   :  { %1244 = vsyncpa [#allocation6 + $0x1], 1 }

</bundles_post_ra>
